<compile_context>
chip_gen: v7x
topology: tpu7x:2x2x1
jax: 0.10.0
libtpu: 0.0.40
codegen_flags: <defaults>
</compile_context>

<pallas_src>
import jax
import jax.numpy as jnp
from jax.experimental import pallas as pl
from jax.experimental.pallas import tpu as pltpu

PRICE_HISTORY_LENGTH = 5
IN_FEATURES = PRICE_HISTORY_LENGTH + 2   # 7
HIDDEN = 16
NUM_ACTIONS = 10

# Tuning knobs (see perf review; sweep batch_tile in 4096..16384 on real HW).
DEFAULT_BATCH_TILE = 16384                     # lanes per grid step
SMALL_BATCH_CUTOFF = 32768                     # single-shot resident kernel up to here
LOGITS_SCRATCH_CAP_BYTES = 16 * 1024 * 1024    # VMEM logits stash cap (tiled path)
_VMEM_LIMIT_BYTES = 32 * 1024 * 1024           # explicit scoped-VMEM limit
_SUBLANE = 8


def _precise_reciprocal(s):
    # EUP approx reciprocal + one Newton-Raphson step: keeps the divide off the
    # VALU critical path while preserving ~f32 accuracy.
    inv = pl.reciprocal(s, approx=True)
    return inv * (2.0 - s * inv)


def _logits(xt, w1_ref, b1_ref, w2_ref):
    """(NUM_ACTIONS, tile) logits for a lane-dense x^T tile (features, tile).

    b2 is intentionally omitted: it is constant along the batch axis and
    cancels exactly in softmax(dim=0).
    """
    h = jnp.dot(w1_ref[...], xt, preferred_element_type=jnp.float32) + b1_ref[...]
    h = jnp.maximum(h, 0.0)
    return jnp.dot(w2_ref[...], h, preferred_element_type=jnp.float32)


def _cost(B, *, x_reads, exp_passes):
    return pl.CostEstimate(
        flops=2 * x_reads * B * (IN_FEATURES * HIDDEN + HIDDEN * NUM_ACTIONS),
        transcendentals=exp_passes * B * NUM_ACTIONS,
        bytes_accessed=4 * B * (x_reads * IN_FEATURES + NUM_ACTIONS)
        + 4 * (HIDDEN * IN_FEATURES + HIDDEN + NUM_ACTIONS * HIDDEN),
    )


# ---------------------------------------------------------------------------
# Small-batch kernel: single invocation, everything in VMEM, softmax over the
# lane (batch) axis.
# ---------------------------------------------------------------------------
def agent_small_kernel(xt_ref, w1_ref, b1_ref, w2_ref, out_ref):
    logits = _logits(xt_ref[...], w1_ref, b1_ref, w2_ref)          # (A, B)
    m = jnp.max(logits, axis=-1, keepdims=True)                    # lane reduce
    e = jnp.exp(logits - m)
    s = jnp.sum(e, axis=-1, keepdims=True)
    out_ref[...] = e * _precise_reciprocal(s)


# ---------------------------------------------------------------------------
# Large-batch kernel: grid = (pass, batch_tile).  Pass 0 accumulates running
# per-action max / sum-of-exp across batch tiles (and stashes logits in VMEM
# when enabled); pass 1 normalizes and writes the lane-dense output.
# ---------------------------------------------------------------------------
def _make_tiled_kernel(B, batch_tile, use_logits_scratch):
    ragged = (B % batch_tile) != 0

    def mask_logits(logits, t):
        # Force padded lanes of the last partial tile to -inf so the lane
        # max / sum-exp and the final store ignore them (padding may be NaN).
        if not ragged:
            return logits
        lane = jax.lax.broadcasted_iota(jnp.int32, logits.shape, 1)
        valid = (t * batch_tile + lane) < B
        return jnp.where(valid, logits, -jnp.inf)

    def kernel(xt_ref, w1_ref, b1_ref, w2_ref, out_ref, m_ref, s_ref, *scratch):
        logits_ref = scratch[0] if use_logits_scratch else None
        p = pl.program_id(0)   # 0 = accumulate softmax stats, 1 = normalize+write
        t = pl.program_id(1)   # batch tile index

        @pl.when((p == 0) & (t == 0))
        def _init():
            m_ref[...] = jnp.full(m_ref.shape, -jnp.inf, m_ref.dtype)
            s_ref[...] = jnp.zeros(s_ref.shape, s_ref.dtype)
            # Defensive: the output block index is parked at 0 for all of
            # pass 0 and is fully rewritten at (p=1, t=0) before its only
            # flush; zero it anyway so uninitialized data can never reach HBM
            # even if revisit/flush semantics change.
            out_ref[...] = jnp.zeros(out_ref.shape, out_ref.dtype)

        @pl.when(p == 0)
        def _accumulate():
            logits = mask_logits(_logits(xt_ref[...], w1_ref, b1_ref, w2_ref), t)
            if use_logits_scratch:
                logits_ref[t] = logits          # VMEM stash, read back in pass 1
            m_new = jnp.maximum(m_ref[...], jnp.max(logits, axis=-1, keepdims=True))
            scale = jnp.exp(m_ref[...] - m_new)            # 0 on the first tile
            s_ref[...] = s_ref[...] * scale + jnp.sum(
                jnp.exp(logits - m_new), axis=-1, keepdims=True)
            m_ref[...] = m_new

        @pl.when(p == 1)
        def _normalize():
            if use_logits_scratch:
                logits = logits_ref[t]          # no x re-read / no recompute
            else:
                logits = mask_logits(_logits(xt_ref[...], w1_ref, b1_ref, w2_ref), t)
            inv = _precise_reciprocal(s_ref[...])
            out_ref[...] = jnp.exp(logits - m_ref[...]) * inv

    return kernel


# ---------------------------------------------------------------------------
# Wrappers
# ---------------------------------------------------------------------------
def agent_forward_fm(xt, w1, b1, w2, b2=None, *,
                     batch_tile=DEFAULT_BATCH_TILE,
                     small_cutoff=SMALL_BATCH_CUTOFF,
                     logits_scratch_cap_bytes=LOGITS_SCRATCH_CAP_BYTES):
    """Feature-major API (preferred): xt is (7, B); returns (10, B).

    Equivalent to softmax(fc2(relu(fc1(x))), dim=0).T with x = xt.T, but with
    no layout-transpose copies at the boundary.  b2 is accepted for API parity
    and analytically dropped (it cancels in softmax over the batch axis).
    """
    del b2
    F, B = xt.shape
    assert F == IN_FEATURES
    xt = xt.astype(jnp.float32)
    w1 = w1.astype(jnp.float32)
    b1 = b1.astype(jnp.float32)
    w2 = w2.astype(jnp.float32)

    # --- Small / moderate batch: single grid step, everything resident. -----
    if B <= small_cutoff:
        return pl.pallas_call(
            agent_small_kernel,
            out_shape=jax.ShapeDtypeStruct((NUM_ACTIONS, B), jnp.float32),
            in_specs=[pl.BlockSpec(memory_space=pltpu.MemorySpace.VMEM)] * 4,
            out_specs=pl.BlockSpec(memory_space=pltpu.MemorySpace.VMEM),
            compiler_params=pltpu.CompilerParams(
                vmem_limit_bytes=_VMEM_LIMIT_BYTES),
            cost_estimate=_cost(B, x_reads=1, exp_passes=1),
        )(xt, w1, b1, w2)

    # --- Large batch: two-pass online softmax over lane-dense batch tiles. --
    assert batch_tile % 128 == 0, "batch_tile must be a multiple of 128 lanes"
    nbt = pl.cdiv(B, batch_tile)               # ragged last tile handled in-kernel

    # Use a VMEM logits stash when it fits (account for sublane padding:
    # NUM_ACTIONS=10 rows pad to 16 per tile slice).
    padded_rows = ((NUM_ACTIONS + _SUBLANE - 1) // _SUBLANE) * _SUBLANE
    scratch_bytes = nbt * padded_rows * batch_tile * 4
    use_scratch = scratch_bytes <= logits_scratch_cap_bytes

    scratch_shapes = [
        pltpu.VMEM((NUM_ACTIONS, 1), jnp.float32),   # running per-action max
        pltpu.VMEM((NUM_ACTIONS, 1), jnp.float32),   # running per-action sum-exp
    ]
    if use_scratch:
        scratch_shapes.append(
            pltpu.VMEM((nbt, NUM_ACTIONS, batch_tile), jnp.float32))
        # Pin x's block index during pass 1: logits come from the VMEM stash,
        # so no per-tile x DMA is issued in the normalize pass.
        x_index_map = lambda p, t: (0, t * (1 - p))
        x_reads = 1
    else:
        x_index_map = lambda p, t: (0, t)            # recompute fallback
        x_reads = 2

    grid_spec = pltpu.PrefetchScalarGridSpec(
        num_scalar_prefetch=0,
        grid=(2, nbt),                               # (pass, batch tile)
        in_specs=[
            pl.BlockSpec((IN_FEATURES, batch_tile), x_index_map),
            # Tiny weights/biases: constant block index -> DMA'd once and
            # resident in VMEM across every grid step.
            pl.BlockSpec((HIDDEN, IN_FEATURES), lambda p, t: (0, 0)),
            pl.BlockSpec((HIDDEN, 1), lambda p, t: (0, 0)),
            pl.BlockSpec((NUM_ACTIONS, HIDDEN), lambda p, t: (0, 0)),
        ],
        # p*t parks the output block at 0 during the stats pass so only
        # finalized pass-1 data is ever flushed to HBM (single write pass).
        out_specs=pl.BlockSpec((NUM_ACTIONS, batch_tile),
                               lambda p, t: (0, p * t)),
        scratch_shapes=scratch_shapes,
    )

    kernel = _make_tiled_kernel(B, batch_tile, use_scratch)
    return pl.pallas_call(
        kernel,
        out_shape=jax.ShapeDtypeStruct((NUM_ACTIONS, B), jnp.float32),
        grid_spec=grid_spec,
        compiler_params=pltpu.CompilerParams(
            dimension_semantics=("arbitrary", "arbitrary"),
            vmem_limit_bytes=_VMEM_LIMIT_BYTES),
        cost_estimate=_cost(B, x_reads=x_reads, exp_passes=2),
    )(xt, w1, b1, w2)


def agent_forward(x, w1, b1, w2, b2=None, **kwargs):
    """Drop-in (B, 7) -> (B, 10) wrapper matching the PyTorch Agent.forward.

    NOTE: the two transposes here are standalone XLA copy kernels whose HBM
    traffic exceeds the Pallas kernel's own at large B; prefer
    agent_forward_fm (feature-major x, action-major output) when the caller
    controls layouts.
    """
    return agent_forward_fm(x.T, w1, b1, w2, b2, **kwargs).T


# ---------------------------------------------------------------------------
# Reference / test harness
# ---------------------------------------------------------------------------
def init_params(key):
    """Deterministic synthetic init, PyTorch nn.Linear (out, in) layout."""
    k1, k2, k3, k4 = jax.random.split(key, 4)
    bound1 = 1.0 / jnp.sqrt(IN_FEATURES)
    bound2 = 1.0 / jnp.sqrt(HIDDEN)
    w1 = jax.random.uniform(k1, (HIDDEN, IN_FEATURES), jnp.float32, -bound1, bound1)
    b1 = jax.random.uniform(k2, (HIDDEN, 1), jnp.float32, -bound1, bound1)
    w2 = jax.random.uniform(k3, (NUM_ACTIONS, HIDDEN), jnp.float32, -bound2, bound2)
    b2 = jax.random.uniform(k4, (NUM_ACTIONS, 1), jnp.float32, -bound2, bound2)
    return w1, b1, w2, b2


def reference_forward(x, w1, b1, w2, b2):
    h = jnp.maximum(x @ w1.T + b1[:, 0], 0.0)
    logits = h @ w2.T + b2[:, 0]
    return jax.nn.softmax(logits, axis=0)   # softmax across the batch (dim=0)


if __name__ == "__main__":
    key = jax.random.PRNGKey(0)
    kp, k1, k2, k3 = jax.random.split(key, 4)
    w1, b1, w2, b2 = init_params(kp)

    # 1) Small batch -> single-shot resident kernel via the drop-in API.
    B_small = 8
    x_small = jax.random.normal(k1, (B_small, IN_FEATURES), dtype=jnp.float32)
    out_small = jax.block_until_ready(agent_forward(x_small, w1, b1, w2, b2))
    ref_small = reference_forward(x_small, w1, b1, w2, b2)
    assert out_small.shape == (B_small, NUM_ACTIONS)
    assert jnp.allclose(out_small, ref_small, atol=1e-5, rtol=1e-5), "small-batch mismatch"

    # 2) Tiled two-pass path with VMEM logits stash + ragged last tile
    #    (forced at small shapes via small_cutoff=0, batch_tile=128).
    B_rag = 400          # 4 tiles of 128 lanes; last tile has only 16 valid lanes
    x_rag = jax.random.normal(k2, (B_rag, IN_FEATURES), dtype=jnp.float32)
    out_rag = jax.block_until_ready(
        agent_forward(x_rag, w1, b1, w2, b2, batch_tile=128, small_cutoff=0))
    ref_rag = reference_forward(x_rag, w1, b1, w2, b2)
    assert out_rag.shape == (B_rag, NUM_ACTIONS)
    assert jnp.allclose(out_rag, ref_rag, atol=1e-5, rtol=1e-4), "tiled/stash mismatch"

    # 3) Tiled recompute fallback (logits stash disabled), feature-major API,
    #    also ragged.
    B_rec = 500
    xt_rec = jax.random.normal(k3, (IN_FEATURES, B_rec), dtype=jnp.float32)
    out_rec_t = jax.block_until_ready(
        agent_forward_fm(xt_rec, w1, b1, w2, b2, batch_tile=128,
                         small_cutoff=0, logits_scratch_cap_bytes=0))
    ref_rec = reference_forward(xt_rec.T, w1, b1, w2, b2)
    assert out_rec_t.shape == (NUM_ACTIONS, B_rec)
    assert jnp.allclose(out_rec_t.T, ref_rec, atol=1e-5, rtol=1e-4), "tiled/recompute mismatch"

    print("KERNEL_OK")
</pallas_src>

<mosaic_0001>
module attributes {stable_mosaic.version = 11 : i64} {
  func.func @agent_small_kernel(%arg0: memref<7x8xf32, #tpu.memory_space<vmem>>, %arg1: memref<16x7xf32, #tpu.memory_space<vmem>>, %arg2: memref<16x1xf32, #tpu.memory_space<vmem>>, %arg3: memref<10x16xf32, #tpu.memory_space<vmem>>, %arg4: memref<10x8xf32, #tpu.memory_space<vmem>>) attributes {dimension_semantics = [], scalar_prefetch = 0 : i64, scratch_operands = 0 : i64, tpu.core_type = #tpu.core_type<tc>} {
    %c0 = arith.constant 0 : index
    %c0_0 = arith.constant 0 : index
    %0 = vector.load %arg0[%c0, %c0_0] : memref<7x8xf32, #tpu.memory_space<vmem>>, vector<7x8xf32>
    %c0_1 = arith.constant 0 : index
    %c0_2 = arith.constant 0 : index
    %1 = vector.load %arg1[%c0_1, %c0_2] : memref<16x7xf32, #tpu.memory_space<vmem>>, vector<16x7xf32>
    %cst = arith.constant dense<0.000000e+00> : vector<16x8xf32>
    %2 = tpu.matmul %1, %0, %cst {dimension_numbers = #tpu.dot_dimension_numbers<[1], [0], [0], [1], [0, 0, 1, 1], [], []>} : vector<16x7xf32>, vector<7x8xf32>, vector<16x8xf32> -> vector<16x8xf32>
    %c0_3 = arith.constant 0 : index
    %c0_4 = arith.constant 0 : index
    %3 = vector.load %arg2[%c0_3, %c0_4] : memref<16x1xf32, #tpu.memory_space<vmem>>, vector<16x1xf32>
    %4 = vector.broadcast %3 : vector<16x1xf32> to vector<16x8xf32>
    %5 = arith.addf %2, %4 : vector<16x8xf32>
    %cst_5 = arith.constant 0.000000e+00 : f32
    %6 = vector.broadcast %cst_5 : f32 to vector<16x8xf32>
    %7 = arith.maximumf %5, %6 : vector<16x8xf32>
    %c0_6 = arith.constant 0 : index
    %c0_7 = arith.constant 0 : index
    %8 = vector.load %arg3[%c0_6, %c0_7] : memref<10x16xf32, #tpu.memory_space<vmem>>, vector<10x16xf32>
    %cst_8 = arith.constant dense<0.000000e+00> : vector<10x8xf32>
    %9 = tpu.matmul %8, %7, %cst_8 {dimension_numbers = #tpu.dot_dimension_numbers<[1], [0], [0], [1], [0, 0, 1, 1], [], []>} : vector<10x16xf32>, vector<16x8xf32>, vector<10x8xf32> -> vector<10x8xf32>
    %cst_9 = arith.constant dense<0xFF800000> : vector<10xf32>
    %10 = vector.multi_reduction <maximumf>, %9, %cst_9 [1] : vector<10x8xf32> to vector<10xf32>
    %11 = vector.shape_cast %10 : vector<10xf32> to vector<10x1xf32>
    %12 = vector.broadcast %11 : vector<10x1xf32> to vector<10x8xf32>
    %13 = arith.subf %9, %12 : vector<10x8xf32>
    %14 = math.exp %13 : vector<10x8xf32>
    %cst_10 = arith.constant dense<0.000000e+00> : vector<10xf32>
    %15 = vector.multi_reduction <add>, %14, %cst_10 [1] : vector<10x8xf32> to vector<10xf32>
    %16 = vector.shape_cast %15 : vector<10xf32> to vector<10x1xf32>
    %17 = tpu.reciprocal %16 {approx = true} : vector<10x1xf32> -> vector<10x1xf32>
    %18 = arith.mulf %16, %17 : vector<10x1xf32>
    %cst_11 = arith.constant 2.000000e+00 : f32
    %19 = vector.broadcast %cst_11 : f32 to vector<10x1xf32>
    %20 = arith.subf %19, %18 : vector<10x1xf32>
    %21 = arith.mulf %17, %20 : vector<10x1xf32>
    %22 = vector.broadcast %21 : vector<10x1xf32> to vector<10x8xf32>
    %23 = arith.mulf %14, %22 : vector<10x8xf32>
    %c0_12 = arith.constant 0 : index
    %c0_13 = arith.constant 0 : index
    %24 = vector.load %arg4[%c0_12, %c0_13] : memref<10x8xf32, #tpu.memory_space<vmem>>, vector<10x8xf32>
    tpu.vector_store %arg4[%c0_12, %c0_13], %23 {strides = array<i32>} : memref<10x8xf32, #tpu.memory_space<vmem>>, vector<10x8xf32>,
    return
  }
}

</mosaic_0001>

<bundles_post_ra>
// kernel: tpu_custom_call.1
= control target key start
LH: loop header
LB: loop body
LE: loop exit
PB: predicated region body
PF: predicated region fallthrough
CT: control target
= control target key end

     0   :  { %vm39_vm0 = vcmask 1046528   ;;  %vm32_vm1 = vcmask 56320   ;;  %v278_v3 = vmov 0   ;;  %vm122_vm2 = vcmask 130048   ;;  %s337_s0 = inlined_call_operand.vmem [shape: f32[7,8], index: 0, kind: input, shape index: {}]   ;;  %s338_s1 = inlined_call_operand.vmem [shape: f32[16,7], index: 1, kind: input, shape index: {}]   ;;  %s339_s2 = inlined_call_operand.vmem [shape: f32[16,1], index: 2, kind: input, shape index: {}]   ;;  %s340_s3 = inlined_call_operand.vmem [shape: f32[10,16], index: 3, kind: input, shape index: {}]   ;;  %s341_s4 = inlined_call_operand.vmem [shape: f32[10,8], index: 4, kind: output, shape index: {}]  }
   0x1   :  { %v17_v0 = vld [vmem:[%s337_s0] sm:$0x7f]  ;;  %v19_v2 = vld [vmem:[%s338_s1 + $0x8] sm:$0xff]  ;;  %269 = vset.pattern.permute.xlu0 %v278_v3  ;;  %vm204_vm3 = vcmask 64512   ;;  %vm208_vm4 = vcmask 58368  }
   0x2   :  { %v18_v1 = vld [vmem:[%s338_s1] sm:$0xff]  ;;  %252 = vmatprep.subr.msk.mxu0 %vm39_vm0, %v17_v0  ;;  %v21_v5 = vld [vmem:[%s339_s2 + $0x8] sm:$0xff] }
   0x3   :  { %254 = vmatprep.mubr.msk.f32.mxu0 %vm32_vm1, %v18_v1  ;;  %v20_v4 = vld [vmem:[%s339_s2] sm:$0xff]  ;;  %253 = vmatpush3.msk.msra.mxu0 %vm39_vm0, %v17_v0  ;;  %v121_v16 = vld [vmem:[%s340_s3 + $0x8] sm:$0x3] }
   0x4   :  { %24 = vperm.xlu0 %269, %v20_v4   ;;  %255 = vmatmul.mubr.msk.f32.vlgmr.msra.gmra.mrb[0].mxu0 %vm32_vm1, %v19_v2  ;;  %v120_v6 = vld [vmem:[%s340_s3] sm:$0xff] }
   0x5   :  { %261 = vmatprep.mubr.msk.f32.mxu1 %vm122_vm2, %v120_v6 }
   0x8   :  { %29 = vperm.xlu0 %269, %v21_v5  }
  0x83   :  { %v25_v7 = vpop.permute.xlu0 %24 }
  0x87   :  { %v30_v8 = vpop.permute.xlu0 %29 }
  0xd7   :  { %v256_v9 = vpop.f32.mrb[0].mxu0 }
  0xd8   :  { %v115_v10 = vadd.f32 %v256_v9, %v30_v8  ;;  %v109_v11 = vpop.f32.mrb[1].mxu0 }
  0xd9   :  { %v110_v12 = vadd.f32 %v109_v11, %v25_v7 }
  0xda   :  { %v119_v13 = vmax.f32 %v115_v10, 0.0 }
  0xdb   :  { %v118_v14 = vmax.f32 %v110_v12, 0.0 }
  0xdd   :  { %v264_v15 = vpack.c.bf16 %v119_v13, %v118_v14 }
  0xdf   :  { %265 = vmatprep.subr.bf16.mxu1 %v264_v15 }
  0xe0   :  { %267 = vmatpush3.bf16.msra.mxu1 %v264_v15 }
  0xe3   :  { %262 = vmatmul.mubr.msk.f32.vlgmr.msra.gmra.mrb[0].mxu1 %vm122_vm2, %v121_v16 }
 0x1b6   :  { %v263_v17 = vpop.f32.mrb[0].mxu1 }
 0x1b7   :  { %v195_v18 = vpop.f32.mrb[1].mxu1  ;;  %v209_v20 = vsel %vm208_vm4, %v263_v17, -inf }
 0x1b8   :  { %v205_v19 = vsel %vm204_vm3, %v195_v18, -inf }
 0x1b9   :  { %206 = vmax.xlane.f32.xlu1 %v205_v19 }
 0x1bd   :  { %210 = vmax.xlane.f32.xlu1 %v209_v20 }
 0x246   :  { %v207_v21 = vpop.xlane.xlu1 %206 }
 0x247   :  { %v212_v22 = vsub.f32 %v195_v18, %v207_v21 }
 0x249   :  { %v214_v23 = vmul.f32 1.442695, %v212_v22 }
 0x24a   :  { %v211_v24 = vpop.xlane.xlu1 %210 }
 0x24b   :  { %270 = vpow2.f32 %v214_v23  ;;  %v213_v25 = vsub.f32 %v263_v17, %v211_v24 }
 0x24d   :  { %v216_v26 = vmul.f32 1.442695, %v213_v25 }
 0x24f   :  { %272 = vpow2.f32 %v216_v26 }
 0x255   :  { %v271_v27 = vpop.eup %270 }
 0x256   :  { %v218_v28 = vsel %vm204_vm3, %v271_v27, 0.0 }
 0x257   :  { %219 = vadd.xlane.f32.xlu0 %v218_v28 }
 0x259   :  { %v273_v29 = vpop.eup %272 }
 0x25a   :  { %v221_v30 = vsel %vm208_vm4, %v273_v29, 0.0 }
 0x25b   :  { %222 = vadd.xlane.f32.xlu1 %v221_v30 }
 0x2e4   :  { %v220_v31 = vpop.xlane.xlu0 %219 }
 0x2e5   :  { %274 = vrcp.f32 %v220_v31 }
 0x2e8   :  { %v223_v32 = vpop.xlane.xlu1 %222 }
 0x2e9   :  { %276 = vrcp.f32 %v223_v32 }
 0x2ef   :  { %v275_v33 = vpop.eup %274 }
 0x2f0   :  { %v226_v34 = vmul.f32 %v275_v33, %v220_v31 }
 0x2f2   :  { %v228_v35 = vsub.f32 2.0, %v226_v34 }
 0x2f3   :  { %v277_v36 = vpop.eup %276 }
 0x2f4   :  { %v230_v37 = vmul.f32 %v275_v33, %v228_v35  ;;  %v227_v38 = vmul.f32 %v277_v36, %v223_v32 }
 0x2f6   :  { %v232_v39 = vmul.f32 %v271_v27, %v230_v37  ;;  %v229_v40 = vsub.f32 2.0, %v227_v38 }
 0x2f8   :  { %234 = vst.msk [vmem:[%s341_s4] sm:$0xff] %vm204_vm3, %v232_v39  ;;  %v231_v41 = vmul.f32 %v277_v36, %v229_v40 }
 0x2fa   :  { %v233_v42 = vmul.f32 %v273_v29, %v231_v41 }
 0x2fc   :  { %235 = vst.msk [vmem:[%s341_s4 + $0x8] sm:$0x3] %vm208_vm4, %v233_v42 }

</bundles_post_ra>
